<compile_context>
chip_gen: v7x
topology: tpu7x:2x2x1
jax: 0.10.0
libtpu: 0.0.40
codegen_flags: <defaults>
</compile_context>

<pallas_src>
import functools

import jax
import jax.numpy as jnp
from jax import lax
from jax.experimental import pallas as pl
from jax.experimental.pallas import tpu as pltpu


def _round_up(v, m):
    return ((v + m - 1) // m) * m


def _sublane_multiple(itemsize):
    # f32 -> 8, bf16 -> 16, int8/fp8 -> 32 (packed sublane layout).
    return max(8, 32 // int(itemsize))


def _choose_tile_rows(n, c, in_itemsize, target_tile_bytes):
    sub = _sublane_multiple(in_itemsize)
    n_pad = _round_up(n, sub)
    rows = max(target_tile_bytes // (c * in_itemsize), sub)
    tn = min(_round_up(rows, sub), n_pad)
    # Per-step footprint: 2 inputs x 2 pipeline buffers + ~6 tile-sized f32
    # temps (f32 casts, e, log-term, ...).  Keep it under a budget that is
    # safe even for v7x's 64 MiB physical VMEM.
    budget = 40 << 20
    while tn > sub and (4 * tn * c * in_itemsize + 6 * tn * c * 4) > budget:
        tn = max(_round_up(tn // 2, sub), sub)
    return tn


def _vmem_limit_bytes(per_step_bytes):
    try:
        cap = pltpu.get_tpu_info().vmem_capacity_bytes
    except Exception:
        cap = 64 << 20  # smallest per-core VMEM across v5e/v6e/v7x
    return int(min(int(0.75 * cap), max(32 << 20, per_step_bytes + (1 << 20))))


def _xent_dense_kernel(x_ref, y_ref, o_ref, *, n_valid, tile_rows, needs_mask):
    x = x_ref[...].astype(jnp.float32)                 # (TN, C)
    y = y_ref[...].astype(jnp.float32)                 # (TN, C)

    # Numerically stable softmax pieces over the class (lane) axis.
    m = jnp.max(x, axis=1, keepdims=True)              # (TN, 1)  XLU lane reduce
    e = jnp.exp(x - m)                                 # (TN, C)  EUP
    denom = jnp.sum(e, axis=1, keepdims=True)          # (TN, 1)  XLU lane reduce

    # Spec-exact to within ulps:  p + 1e-7 == (e + 1e-7*denom) / denom, hence
    #   sum_c y*log(p + 1e-7) = sum_c y*log(e + 1e-7*denom) - log(denom)*sum_c y
    # (folds the per-element divide away; the (TN,C) log stays per the spec).
    s1 = jnp.sum(y * jnp.log(e + 1e-7 * denom), axis=1, keepdims=True)   # (TN,1)
    per_sample = s1 - jnp.log(denom) * jnp.sum(y, axis=1, keepdims=True)

    if needs_mask:  # static: only the padded-grid case pays for the mask
        row = (pl.program_id(0) * tile_rows
               + lax.broadcasted_iota(jnp.int32, per_sample.shape, 0))
        per_sample = jnp.where(row < n_valid, per_sample, 0.0)

    tile_sum = jnp.sum(per_sample, axis=0, keepdims=True)        # (1, 1)
    o_ref[...] = jnp.broadcast_to(tile_sum[None], o_ref.shape)   # (1, 1, 128)


def _xent_labels_kernel(x_ref, lbl_ref, o_ref, *, n_valid, tile_rows, needs_mask):
    x = x_ref[...].astype(jnp.float32)                 # (TN, C)
    lbl = lbl_ref[...]                                 # (TN, 1) int32

    m = jnp.max(x, axis=1, keepdims=True)
    e = jnp.exp(x - m)
    denom = jnp.sum(e, axis=1, keepdims=True)

    # Select e[label] without ever materializing a one-hot in HBM.
    col = lax.broadcasted_iota(jnp.int32, x.shape, 1)  # (TN, C)
    e_lbl = jnp.sum(jnp.where(col == lbl, e, 0.0), axis=1, keepdims=True)
    # log(P_label + 1e-7) = log(e_lbl + 1e-7*denom) - log(denom)
    per_sample = jnp.log(e_lbl + 1e-7 * denom) - jnp.log(denom)  # (TN, 1)

    if needs_mask:
        row = (pl.program_id(0) * tile_rows
               + lax.broadcasted_iota(jnp.int32, per_sample.shape, 0))
        per_sample = jnp.where(row < n_valid, per_sample, 0.0)

    tile_sum = jnp.sum(per_sample, axis=0, keepdims=True)
    o_ref[...] = jnp.broadcast_to(tile_sum[None], o_ref.shape)


def my_cross_entropy(x, y, *, tile_rows=None, target_tile_bytes=2 << 20):
    """Dense-target path. x: (N, C) logits, y: (N, C) targets (one-hot or soft).

    Returns scalar f32.  f32 or bf16 inputs accepted; bf16 is recommended for
    this HBM-bandwidth-bound kernel (compute is always f32 in-kernel).
    """
    assert x.shape == y.shape and x.ndim == 2
    n, c = x.shape
    in_itemsize = max(jnp.dtype(x.dtype).itemsize, jnp.dtype(y.dtype).itemsize)

    if tile_rows is None:
        tn = _choose_tile_rows(n, c, in_itemsize, target_tile_bytes)
    else:
        sub = _sublane_multiple(in_itemsize)
        tn = min(_round_up(tile_rows, sub), _round_up(n, sub))

    grid = pl.cdiv(n, tn)
    needs_mask = grid * tn != n
    per_step = 4 * tn * c * in_itemsize + 6 * tn * c * 4

    kernel = functools.partial(_xent_dense_kernel, n_valid=n, tile_rows=tn,
                               needs_mask=needs_mask)
    partial_sums = pl.pallas_call(
        kernel,
        out_shape=jax.ShapeDtypeStruct((grid, 1, 128), jnp.float32),
        grid=(grid,),
        in_specs=[
            pl.BlockSpec((tn, c), lambda i: (i, 0)),
            pl.BlockSpec((tn, c), lambda i: (i, 0)),
        ],
        out_specs=pl.BlockSpec((1, 1, 128), lambda i: (i, 0, 0)),
        compiler_params=pltpu.CompilerParams(
            dimension_semantics=("parallel",),        # tiles are independent
            vmem_limit_bytes=_vmem_limit_bytes(per_step),
        ),
    )(x, y)
    # Final reduce / mean / negate in the wrapper (kept out of the kernel so
    # the grid axis can be fully parallel across TensorCores).
    return -(jnp.sum(partial_sums[:, 0, 0]) / n)


def my_cross_entropy_int_labels(x, labels, *, tile_rows=None,
                                target_tile_bytes=2 << 20):
    """Hard-label fast path: equivalent to my_cross_entropy(x, one_hot(labels, C))
    but never streams the dense one-hot target from HBM (~2x fewer bytes)."""
    assert x.ndim == 2 and labels.shape == (x.shape[0],)
    n, c = x.shape
    in_itemsize = jnp.dtype(x.dtype).itemsize

    if tile_rows is None:
        tn = _choose_tile_rows(n, c, in_itemsize, target_tile_bytes)
    else:
        sub = _sublane_multiple(in_itemsize)
        tn = min(_round_up(tile_rows, sub), _round_up(n, sub))

    grid = pl.cdiv(n, tn)
    needs_mask = grid * tn != n
    lbl2d = labels.astype(jnp.int32).reshape(n, 1)
    per_step = 2 * tn * c * in_itemsize + 4 * tn * c * 4

    kernel = functools.partial(_xent_labels_kernel, n_valid=n, tile_rows=tn,
                               needs_mask=needs_mask)
    partial_sums = pl.pallas_call(
        kernel,
        out_shape=jax.ShapeDtypeStruct((grid, 1, 128), jnp.float32),
        grid=(grid,),
        in_specs=[
            pl.BlockSpec((tn, c), lambda i: (i, 0)),
            pl.BlockSpec((tn, 1), lambda i: (i, 0)),
        ],
        out_specs=pl.BlockSpec((1, 1, 128), lambda i: (i, 0, 0)),
        compiler_params=pltpu.CompilerParams(
            dimension_semantics=("parallel",),
            vmem_limit_bytes=_vmem_limit_bytes(per_step),
        ),
    )(x, lbl2d)
    return -(jnp.sum(partial_sums[:, 0, 0]) / n)


def _reference(x, y):
    p = jax.nn.softmax(x.astype(jnp.float32), axis=1)
    return -jnp.mean(
        jnp.sum(y.astype(jnp.float32) * jnp.log(p + 1e-7), axis=1), axis=0
    )


if __name__ == "__main__":
    key = jax.random.PRNGKey(0)
    k1, k2, k3, k4, k5, k6 = jax.random.split(key, 6)

    # Case 1: small shape implied by the module (single tile, grid=1).
    N1, C1 = 8, 32
    x1 = jax.random.normal(k1, (N1, C1), dtype=jnp.float32)
    y1 = jax.nn.one_hot(jax.random.randint(k2, (N1,), 0, C1), C1, dtype=jnp.float32)
    loss1 = my_cross_entropy(x1, y1)
    jax.block_until_ready(loss1)
    ref1 = _reference(x1, y1)
    assert jnp.allclose(loss1, ref1, rtol=1e-5, atol=1e-5), (loss1, ref1)

    # Case 2: multi-tile parallel grid with a ragged last tile (exercises the
    # per-tile partial sums and the padded-row masking).
    N2, C2 = 20, 160
    x2 = jax.random.normal(k3, (N2, C2), dtype=jnp.float32)
    lbl2 = jax.random.randint(k4, (N2,), 0, C2)
    y2 = jax.nn.one_hot(lbl2, C2, dtype=jnp.float32)
    loss2 = my_cross_entropy(x2, y2, tile_rows=8)
    jax.block_until_ready(loss2)
    ref2 = _reference(x2, y2)
    assert jnp.allclose(loss2, ref2, rtol=1e-5, atol=1e-5), (loss2, ref2)

    # Case 3: integer-label fast path (no dense one-hot streamed from HBM).
    loss3 = my_cross_entropy_int_labels(x2, lbl2, tile_rows=8)
    jax.block_until_ready(loss3)
    assert jnp.allclose(loss3, ref2, rtol=1e-5, atol=1e-5), (loss3, ref2)

    # Case 4: bf16 inputs (half the HBM bytes; f32 compute in-kernel,
    # 16-row sublane rounding path).
    N4, C4 = 33, 256
    x4 = jax.random.normal(k5, (N4, C4), dtype=jnp.bfloat16)
    y4 = jax.nn.one_hot(jax.random.randint(k6, (N4,), 0, C4), C4,
                        dtype=jnp.bfloat16)
    loss4 = my_cross_entropy(x4, y4)
    jax.block_until_ready(loss4)
    ref4 = _reference(x4, y4)
    assert jnp.allclose(loss4, ref4, rtol=1e-4, atol=1e-4), (loss4, ref4)

    print("KERNEL_OK")
</pallas_src>

<mosaic_0001>
module attributes {stable_mosaic.version = 11 : i64} {
  func.func @_xent_dense_kernel(%arg0: i32, %arg1: memref<8x32xf32, #tpu.memory_space<vmem>>, %arg2: memref<8x32xf32, #tpu.memory_space<vmem>>, %arg3: memref<1x1x128xf32, #tpu.memory_space<vmem>>) attributes {dimension_semantics = [#tpu.dimension_semantics<parallel>], iteration_bounds = array<i64: 1>, scalar_prefetch = 0 : i64, scratch_operands = 0 : i64, tpu.core_type = #tpu.core_type<tc>, window_params = [{transform_indices = @transform_0, window_bounds = array<i64: 8, 32>}, {transform_indices = @transform_1, window_bounds = array<i64: 8, 32>}, {transform_indices = @transform_2, window_bounds = array<i64: 1, 1, 128>}]} {
    %c0 = arith.constant 0 : index
    %c0_0 = arith.constant 0 : index
    %0 = vector.load %arg1[%c0, %c0_0] : memref<8x32xf32, #tpu.memory_space<vmem>>, vector<8x32xf32>
    %c0_1 = arith.constant 0 : index
    %c0_2 = arith.constant 0 : index
    %1 = vector.load %arg2[%c0_1, %c0_2] : memref<8x32xf32, #tpu.memory_space<vmem>>, vector<8x32xf32>
    %cst = arith.constant dense<0xFF800000> : vector<8xf32>
    %2 = vector.multi_reduction <maximumf>, %0, %cst [1] : vector<8x32xf32> to vector<8xf32>
    %3 = vector.shape_cast %2 : vector<8xf32> to vector<8x1xf32>
    %4 = vector.broadcast %3 : vector<8x1xf32> to vector<8x32xf32>
    %5 = arith.subf %0, %4 : vector<8x32xf32>
    %6 = math.exp %5 : vector<8x32xf32>
    %cst_3 = arith.constant dense<0.000000e+00> : vector<8xf32>
    %7 = vector.multi_reduction <add>, %6, %cst_3 [1] : vector<8x32xf32> to vector<8xf32>
    %8 = vector.shape_cast %7 : vector<8xf32> to vector<8x1xf32>
    %cst_4 = arith.constant 1.000000e-07 : f32
    %9 = vector.broadcast %cst_4 : f32 to vector<8x1xf32>
    %10 = arith.mulf %9, %8 : vector<8x1xf32>
    %11 = vector.broadcast %10 : vector<8x1xf32> to vector<8x32xf32>
    %12 = arith.addf %6, %11 : vector<8x32xf32>
    %13 = math.log %12 : vector<8x32xf32>
    %14 = arith.mulf %1, %13 : vector<8x32xf32>
    %cst_5 = arith.constant dense<0.000000e+00> : vector<8xf32>
    %15 = vector.multi_reduction <add>, %14, %cst_5 [1] : vector<8x32xf32> to vector<8xf32>
    %16 = vector.shape_cast %15 : vector<8xf32> to vector<8x1xf32>
    %17 = math.log %8 : vector<8x1xf32>
    %cst_6 = arith.constant dense<0.000000e+00> : vector<8xf32>
    %18 = vector.multi_reduction <add>, %1, %cst_6 [1] : vector<8x32xf32> to vector<8xf32>
    %19 = vector.shape_cast %18 : vector<8xf32> to vector<8x1xf32>
    %20 = arith.mulf %17, %19 : vector<8x1xf32>
    %21 = arith.subf %16, %20 : vector<8x1xf32>
    %cst_7 = arith.constant dense<0.000000e+00> : vector<1xf32>
    %22 = vector.multi_reduction <add>, %21, %cst_7 [0] : vector<8x1xf32> to vector<1xf32>
    %23 = vector.shape_cast %22 : vector<1xf32> to vector<1x1xf32>
    %24 = vector.shape_cast %23 : vector<1x1xf32> to vector<1x1x1xf32>
    %25 = vector.shape_cast %24 : vector<1x1x1xf32> to vector<1x1x1xf32>
    %26 = vector.broadcast %25 : vector<1x1x1xf32> to vector<1x1x128xf32>
    %c0_8 = arith.constant 0 : index
    %c0_9 = arith.constant 0 : index
    %c0_10 = arith.constant 0 : index
    %27 = vector.load %arg3[%c0_8, %c0_9, %c0_10] : memref<1x1x128xf32, #tpu.memory_space<vmem>>, vector<1x1x128xf32>
    tpu.vector_store %arg3[%c0_8, %c0_9, %c0_10], %26 {strides = array<i32>} : memref<1x1x128xf32, #tpu.memory_space<vmem>>, vector<1x1x128xf32>,
    return
  }
  func.func @transform_0(%arg0: i32) -> (i32, i32) {
    %c0_i32 = arith.constant 0 : i32
    %c0_i32_0 = arith.constant 0 : i32
    return %arg0, %c0_i32 : i32, i32
  }
  func.func @transform_1(%arg0: i32) -> (i32, i32) {
    %c0_i32 = arith.constant 0 : i32
    %c0_i32_0 = arith.constant 0 : i32
    return %arg0, %c0_i32 : i32, i32
  }
  func.func @transform_2(%arg0: i32) -> (i32, i32, i32) {
    %c0_i32 = arith.constant 0 : i32
    %c0_i32_0 = arith.constant 0 : i32
    %c0_i32_1 = arith.constant 0 : i32
    return %arg0, %c0_i32, %c0_i32_0 : i32, i32, i32
  }
}

</mosaic_0001>

<bundles_post_ra>
// kernel: tpu_custom_call.1
= control target key start
LH: loop header
LB: loop body
LE: loop exit
PB: predicated region body
PF: predicated region fallthrough
CT: control target
= control target key end

     0   :  { %7 = vsyncpa [#allocation3], 0  ;;  %s225_s0 = inlined_call_operand.hbm [shape: f32[8,32], index: 0, kind: input, shape index: {}]   ;;  %s226_s1 = inlined_call_operand.hbm [shape: f32[8,32], index: 1, kind: input, shape index: {}]   ;;  %s227_s2 = inlined_call_operand.hbm [shape: f32[1,1,128], index: 2, kind: output, shape index: {}]  }
   0x1   :  { %8 = vsyncpa [#allocation6], 0 }
   0x2   :  { %9 = vsyncpa [#allocation4], 0  ;;  %s167_s9 = smov [#allocation2]   ;;  %s168_s11 = smov [#allocation5]  }
   0x3   :  { %s16_s10 = sshll.u32 %s167_s9, 4  ;;  %s26_s12 = sshll.u32 %s168_s11, 4  ;;  %s17_s10 = int_to_ptr.vmem [resolvable:$true] %s16_s10  ;;  %s27_s12 = int_to_ptr.vmem [resolvable:$true] %s26_s12 }
   0x4   :  { %s95_s15 = scalar_lea.hbm %s225_s0, 128 }
   0x5   :  { %p96_p0 = scmp.ne.s32.totalorder %s225_s0, %s95_s15  ;;  %p99_p1 = scmp.lt.u32.totalorder %s95_s15, %s225_s0 }
   0x7   :  { %p101_p2 = pnand %p99_p1, %p96_p0 }
   0x9   :  { %104 = shalt.err (!%p101_p2)
}
   0xa   :  { %s105_s20 = scalar_lea.vmem %s17_s10, 128  ;;  %p110_p4 = scmp.lt.s32.totalorder %s17_s10, %s17_s10 }
   0xb   :  { %p106_p3 = scmp.ne.s32.totalorder %s17_s10, %s105_s20  ;;  %p111_p5 = scmp.lt.s32.totalorder %s105_s20, %s105_s20 }
   0xd   :  { %p112_p6 = por %p111_p5, %p110_p4 }
   0xf   :  { %p113_p7 = pnand %p112_p6, %p106_p3 }
  0x11   :  { %116 = shalt.err (!%p113_p7)
}
  0x12   :  { %19 = dma.hbm_to_vmem [thread:$0]  %s225_s0, 128, %s17_s10, [#allocation3]  }
  0x13   :  { %s117_s25 = scalar_lea.hbm %s226_s1, 128 }
  0x14   :  { %p118_p8 = scmp.ne.s32.totalorder %s226_s1, %s117_s25  ;;  %p121_p9 = scmp.lt.u32.totalorder %s117_s25, %s226_s1 }
  0x16   :  { %p123_p10 = pnand %p121_p9, %p118_p8 }
  0x18   :  { %126 = shalt.err (!%p123_p10)
}
  0x19   :  { %s127_s30 = scalar_lea.vmem %s27_s12, 128  ;;  %p132_p12 = scmp.lt.s32.totalorder %s27_s12, %s27_s12 }
  0x1a   :  { %p128_p11 = scmp.ne.s32.totalorder %s27_s12, %s127_s30  ;;  %p133_p13 = scmp.lt.s32.totalorder %s127_s30, %s127_s30 }
  0x1c   :  { %p134_p0 = por %p133_p13, %p132_p12 }
  0x1e   :  { %p135_p1 = pnand %p134_p0, %p128_p11 }
  0x20   :  { %138 = shalt.err (!%p135_p1)
}
  0x21   :  { %29 = dma.hbm_to_vmem [thread:$0]  %s226_s1, 128, %s27_s12, [#allocation6]  }
  0x22   :  { %161 = dma.done.wait [#allocation3], 128  }
  0x23   :  { %162 = vsyncadd [#allocation3], 4294967168 }
  0x24   :  { %163 = dma.done.wait [#allocation6], 128  }
  0x25   :  { %164 = vsyncadd [#allocation6], 4294967168  ;;  %vm38_vm0 = vcmask 261120   ;;  %v36_v0 = vld [vmem:[#allocation2] sm:$0xff]  ;;  %v37_v2 = vld [vmem:[#allocation5] sm:$0xff]  ;;  %s169_s1 = smov [#allocation7]  }
  0x26   :  { %v39_v1 = vsel %vm38_vm0, %v36_v0, -inf  ;;  %v58_v3 = vsel %vm38_vm0, %v37_v2, 0.0  ;;  %s76_s4 = sshll.u32 %s169_s1, 4  ;;  %s77_s4 = int_to_ptr.vmem [resolvable:$true] %s76_s4 }
  0x27   :  { %40 = vmax.xlane.f32.xlu0 %v39_v1  ;;  %59 = vadd.xlane.f32.xlu1 %v58_v3  ;;  %s139_s5 = scalar_lea.vmem %s77_s4, 16  ;;  %s143_s6 = scalar_lea.vmem %s77_s4, 32 }
  0x28   :  { %p140_p2 = scmp.ne.s32.totalorder %s77_s4, %s139_s5  ;;  %p144_p3 = scmp.lt.s32.totalorder %s77_s4, %s77_s4 }
  0x29   :  { %p145_p4 = scmp.lt.s32.totalorder %s143_s6, %s139_s5 }
  0x2b   :  { %p146_p5 = por %p145_p4, %p144_p3 }
  0x2d   :  { %p147_p6 = pnand %p146_p5, %p140_p2 }
  0xb4   :  { %v41_v4 = vpop.xlane.xlu0 %40  ;;  %v60_v18 = vpop.xlane.xlu1 %59 }
  0xb5   :  { %v42_v5 = vsub.f32 %v36_v0, %v41_v4 }
  0xb7   :  { %v43_v6 = vmul.f32 1.442695, %v42_v5 }
  0xb9   :  { %89 = vpow2.f32 %v43_v6 }
  0xc3   :  { %v90_v7 = vpop.eup %89 }
  0xc4   :  { %v45_v8 = vsel %vm38_vm0, %v90_v7, 0.0 }
  0xc5   :  { %46 = vadd.xlane.f32.xlu0 %v45_v8 }
 0x152   :  { %v47_v9 = vpop.xlane.xlu0 %46 }
 0x153   :  { %v48_v10 = vmul.f32 1e-07, %v47_v9 }
 0x155   :  { %v49_v11 = vadd.f32 %v90_v7, %v48_v10 }
 0x157   :  { %91 = vlog2.f32 %v49_v11 }
 0x158   :  { %93 = vlog2.f32 %v47_v9 }
 0x161   :  { %v92_v12 = vpop.eup %91 }
 0x162   :  { %v51_v13 = vmul.f32 0.6931472, %v92_v12  ;;  %v94_v16 = vpop.eup %93 }
 0x163   :  { %v57_v17 = vmul.f32 0.6931472, %v94_v16 }
 0x164   :  { %v52_v14 = vmul.f32 %v51_v13, %v37_v2 }
 0x165   :  { %v61_v19 = vmul.f32 %v60_v18, %v57_v17 }
 0x166   :  { %v53_v15 = vsel %vm38_vm0, %v52_v14, 0.0 }
 0x167   :  { %54 = vadd.xlane.f32.xlu1 %v53_v15 }
 0x1f4   :  { %v55_v20 = vpop.xlane.xlu1 %54 }
 0x1f5   :  { %v62_v21 = vsub.f32 %v55_v20, %v61_v19 }
 0x1f7   :  { %v63_v22 = vrot.slane %v62_v21, 4 }
 0x1f9   :  { %v64_v23 = vadd.f32 %v63_v22, %v62_v21 }
 0x1fb   :  { %v65_v24 = vrot.slane %v64_v23, 2 }
 0x1fd   :  { %v66_v25 = vadd.f32 %v65_v24, %v64_v23 }
 0x1ff   :  { %v67_v26 = vrot.slane %v66_v25, 1 }
 0x201   :  { %v68_v27 = vadd.f32 %v67_v26, %v66_v25 }
 0x203   :  { %69 = vst [vmem:[#allocation7] sm:$0x1] %v68_v27 }
 0x204   :  { %150 = shalt.err (!%p147_p6)
}
 0x205   :  { %s151_s9 = scalar_lea.hbm %s227_s2, 16 }
 0x206   :  { %p152_p7 = scmp.ne.s32.totalorder %s227_s2, %s151_s9  ;;  %p155_p8 = scmp.lt.u32.totalorder %s151_s9, %s227_s2 }
 0x208   :  { %p157_p9 = pnand %p155_p8, %p152_p7 }
 0x20a   :  { %160 = shalt.err (!%p157_p9)
}
 0x20b   :  { %79 = dma.vmem_to_hbm [thread:$0]  %s77_s4, 16, %s227_s2, [#allocation4]  }
 0x20c   :  { %165 = dma.done.wait [#allocation4], 16  }
 0x20d   :  { %166 = vsyncadd [#allocation4], 4294967280 }
 0x20e   :  { %83 = vsyncpa [#allocation3], 1 }
 0x20f   :  { %84 = vsyncpa [#allocation6], 1 }
 0x210   :  { %85 = vsyncpa [#allocation4], 1 }

</bundles_post_ra>
